<compile_context>
chip_gen: v7x
topology: tpu7x:2x2x1
jax: 0.10.0
libtpu: 0.0.40
codegen_flags: <defaults>
</compile_context>

<pallas_src>
import math

import jax
import jax.numpy as jnp
from jax.experimental import pallas as pl
from jax.experimental.pallas import tpu as pltpu

_LANE = 128        # lane width: output last dim padded to this when needed
_SUBLANE = 8       # sublane granularity for the row tile
_NEG_BIG = -1e30   # bias on padded output columns -> exp(z - max) == 0


def _round_up(x, m):
    return (x + m - 1) // m * m


def _vmem_cap_bytes():
    """Physical VMEM per core, with a conservative fallback."""
    try:
        return int(pltpu.get_tpu_info().vmem_capacity_bytes)
    except Exception:
        return 64 * 1024 * 1024  # covers v7x; v5e/v6e just get a smaller cap


def _softmax_linear_kernel(x_ref, w_ref, b_ref, o_ref):
    # MXU matmul with f32 accumulation + bias + stable softmax along lanes.
    # Padded output columns carry bias = -1e30 and thus vanish from the sum.
    z = jnp.dot(x_ref[...], w_ref[...], preferred_element_type=jnp.float32)
    z = z + b_ref[...]                              # broadcast (1, d_out_p)
    z = z - jnp.max(z, axis=-1, keepdims=True)      # XLU row reduction
    e = jnp.exp(z)                                  # EUP
    denom = jnp.sum(e, axis=-1, keepdims=True)      # XLU row reduction
    o_ref[...] = (e / denom).astype(o_ref.dtype)    # exact normalization


def make_softmax_layer(weight, bias, *, row_tile=512,
                       compute_dtype=jnp.bfloat16, out_dtype=None):
    """Build forward(x) computing softmax(x @ weight.T + bias, axis=-1).

    weight: [D_out, D_in] (PyTorch nn.Linear layout), bias: [D_out].
    The transpose + lane padding of weight/bias happen once here.

    compute_dtype=bfloat16 (default) halves x/weight DMA bytes on every
    generation (v5e/v6e/v7x all run bf16 MXU inputs at full rate); the MXU
    accumulation and all softmax math stay f32.  Results differ from a
    PyTorch f32 Linear at the bf16-input level of precision; pass
    compute_dtype=jnp.float32 for bit-closer results.
    """
    d_out, d_in = weight.shape
    d_out_p = _round_up(max(d_out, _LANE), _LANE)
    pad_out = d_out_p != d_out

    # Weight.T in compute dtype; padded output columns are zero.
    if pad_out:
        w_t = jnp.zeros((d_in, d_out_p), dtype=compute_dtype)
        w_t = w_t.at[:, :d_out].set(weight.T.astype(compute_dtype))
        # Bias stays f32 (required for the -1e30 padded-column trick).
        b2d = jnp.full((1, d_out_p), _NEG_BIG, dtype=jnp.float32)
        b2d = b2d.at[0, :d_out].set(bias.astype(jnp.float32))
    else:
        w_t = weight.T.astype(compute_dtype)
        b2d = bias.astype(jnp.float32).reshape(1, d_out_p)

    in_bytes = jnp.dtype(compute_dtype).itemsize
    vmem_cap = _vmem_cap_bytes()
    budget = vmem_cap - 8 * 1024 * 1024  # headroom for compiler scratch/sems

    def forward(x):
        assert x.ndim == 2 and x.shape[1] == d_in, "feature dim mismatch"
        n = x.shape[0]
        o_dtype = out_dtype if out_dtype is not None else x.dtype
        out_bytes = jnp.dtype(o_dtype).itemsize

        # --- row tile selection -------------------------------------------
        n8 = _round_up(n, _SUBLANE)
        tile = min(_round_up(row_tile, _SUBLANE), n8)
        if n8 >= 2 * _SUBLANE:
            # v7x megacore: guarantee >= 2 grid steps so both TCs get work.
            tile = min(tile, _round_up(pl.cdiv(n8, 2), _SUBLANE))
        # Shrink only if the VMEM budget requires it (single-buffered weight).
        resident = d_in * d_out_p * in_bytes + d_out_p * 4
        while (tile > _SUBLANE and
               resident + 2 * tile * (d_in * in_bytes + d_out_p * out_bytes)
               > budget):
            tile = max(_SUBLANE, _round_up(tile // 2, _SUBLANE))
        grid = (pl.cdiv(n, tile),)

        # --- inputs: avoid host-side pad/copy; cast only when needed -------
        x_in = x if x.dtype == compute_dtype else x.astype(compute_dtype)

        vmem_need = (2 * tile * d_in * in_bytes          # double-buffered x
                     + 2 * tile * d_out_p * out_bytes    # double-buffered out
                     + d_in * d_out_p * in_bytes         # Buffered(1) weight
                     + d_out_p * 4)                      # Buffered(1) bias
        vmem_limit = int(min(budget,
                             max(vmem_need + 4 * 1024 * 1024,
                                 32 * 1024 * 1024)))

        cost = pl.CostEstimate(
            flops=2 * n * d_in * d_out_p,
            transcendentals=n * d_out_p,
            bytes_accessed=(n * d_in * in_bytes
                            + d_in * d_out_p * in_bytes
                            + d_out_p * 4
                            + n * d_out_p * out_bytes),
        )

        y = pl.pallas_call(
            _softmax_linear_kernel,
            out_shape=jax.ShapeDtypeStruct((n, d_out_p), o_dtype),
            grid_spec=pltpu.PrefetchScalarGridSpec(
                num_scalar_prefetch=0,
                grid=grid,
                in_specs=[
                    pl.BlockSpec((tile, d_in), lambda i: (i, 0)),
                    # Grid-invariant: single buffer (no double-buffer waste).
                    pl.BlockSpec((d_in, d_out_p), lambda i: (0, 0),
                                 pipeline_mode=pl.Buffered(1)),
                    pl.BlockSpec((1, d_out_p), lambda i: (0, 0),
                                 pipeline_mode=pl.Buffered(1)),
                ],
                out_specs=pl.BlockSpec((tile, d_out_p), lambda i: (i, 0)),
            ),
            compiler_params=pltpu.CompilerParams(
                dimension_semantics=("parallel",),
                vmem_limit_bytes=vmem_limit,
            ),
            cost_estimate=cost,
        )(x_in, w_t, b2d)

        # Strip column padding only when it was added.
        return y[:, :d_out] if pad_out else y

    return forward


def softmax_layer_forward(x, weight, bias, *, row_tile=512,
                          compute_dtype=jnp.bfloat16, out_dtype=None):
    """One-shot convenience wrapper (prefer make_softmax_layer for reuse)."""
    return make_softmax_layer(weight, bias, row_tile=row_tile,
                              compute_dtype=compute_dtype,
                              out_dtype=out_dtype)(x)


def init_params(key, input_dim, output_dim):
    # xavier_uniform_ on weight [out, in], zeros on bias — matches __init__.
    bound = math.sqrt(6.0 / (input_dim + output_dim))
    weight = jax.random.uniform(
        key, (output_dim, input_dim), dtype=jnp.float32,
        minval=-bound, maxval=bound)
    bias = jnp.zeros((output_dim,), dtype=jnp.float32)
    return weight, bias


if __name__ == "__main__":
    key = jax.random.PRNGKey(0)
    k_x, k_w = jax.random.split(key)

    # N deliberately NOT a tile multiple (ragged last block); small feature
    # dims exercise the unpadded-D_in and lane-padded-D_out paths.
    N, D_in, D_out = 300, 32, 16
    x = jax.random.normal(k_x, (N, D_in), dtype=jnp.float32)
    weight, bias = init_params(k_w, D_in, D_out)

    ref = jax.nn.softmax(x @ weight.T + bias, axis=-1)

    # f32-input path: close to the plain-JAX reference.
    fwd_f32 = make_softmax_layer(weight, bias, compute_dtype=jnp.float32)
    y32 = jax.block_until_ready(fwd_f32(x))
    assert y32.shape == (N, D_out)
    assert jnp.allclose(y32, ref, atol=2e-3, rtol=2e-3)
    assert jnp.allclose(jnp.sum(y32, axis=-1), jnp.ones((N,)), atol=1e-4)

    # Default bf16-input path: f32 accumulation + f32 softmax, looser match
    # to the f32 reference, but rows still sum to 1 exactly (exact divide).
    fwd_bf16 = make_softmax_layer(weight, bias)
    ybf = jax.block_until_ready(fwd_bf16(x))
    assert ybf.shape == (N, D_out)
    assert jnp.allclose(ybf, ref, atol=3e-2, rtol=3e-2)
    assert jnp.allclose(jnp.sum(ybf, axis=-1), jnp.ones((N,)), atol=1e-4)

    print("KERNEL_OK")
</pallas_src>

<mosaic_0001>
module attributes {stable_mosaic.version = 11 : i64} {
  func.func @_softmax_linear_kernel(%arg0: i32, %arg1: memref<152x32xf32, #tpu.memory_space<vmem>>, %arg2: memref<32x128xf32, #tpu.memory_space<vmem>>, %arg3: memref<1x128xf32, #tpu.memory_space<vmem>>, %arg4: memref<152x128xf32, #tpu.memory_space<vmem>>) attributes {dimension_semantics = [#tpu.dimension_semantics<parallel>], iteration_bounds = array<i64: 2>, scalar_prefetch = 0 : i64, scratch_operands = 0 : i64, tpu.core_type = #tpu.core_type<tc>, window_params = [{transform_indices = @transform_0, window_bounds = array<i64: 152, 32>}, {pipeline_mode = #tpu.pipeline_mode<synchronous>, transform_indices = @transform_1, window_bounds = array<i64: 32, 128>}, {pipeline_mode = #tpu.pipeline_mode<synchronous>, transform_indices = @transform_2, window_bounds = array<i64: 1, 128>}, {transform_indices = @transform_3, window_bounds = array<i64: 152, 128>}]} {
    %c0 = arith.constant 0 : index
    %c0_0 = arith.constant 0 : index
    %0 = vector.load %arg1[%c0, %c0_0] : memref<152x32xf32, #tpu.memory_space<vmem>>, vector<152x32xf32>
    %c0_1 = arith.constant 0 : index
    %c0_2 = arith.constant 0 : index
    %1 = vector.load %arg2[%c0_1, %c0_2] : memref<32x128xf32, #tpu.memory_space<vmem>>, vector<32x128xf32>
    %cst = arith.constant dense<0.000000e+00> : vector<152x128xf32>
    %2 = tpu.matmul %0, %1, %cst {dimension_numbers = #tpu.dot_dimension_numbers<[1], [0], [0], [1], [0, 0, 1, 1], [], []>} : vector<152x32xf32>, vector<32x128xf32>, vector<152x128xf32> -> vector<152x128xf32>
    %c0_3 = arith.constant 0 : index
    %c0_4 = arith.constant 0 : index
    %3 = vector.load %arg3[%c0_3, %c0_4] : memref<1x128xf32, #tpu.memory_space<vmem>>, vector<1x128xf32>
    %4 = vector.broadcast %3 : vector<1x128xf32> to vector<152x128xf32>
    %5 = arith.addf %2, %4 : vector<152x128xf32>
    %cst_5 = arith.constant dense<0xFF800000> : vector<152xf32>
    %6 = vector.multi_reduction <maximumf>, %5, %cst_5 [1] : vector<152x128xf32> to vector<152xf32>
    %7 = vector.shape_cast %6 : vector<152xf32> to vector<152x1xf32>
    %8 = vector.broadcast %7 : vector<152x1xf32> to vector<152x128xf32>
    %9 = arith.subf %5, %8 : vector<152x128xf32>
    %10 = math.exp %9 : vector<152x128xf32>
    %cst_6 = arith.constant dense<0.000000e+00> : vector<152xf32>
    %11 = vector.multi_reduction <add>, %10, %cst_6 [1] : vector<152x128xf32> to vector<152xf32>
    %12 = vector.shape_cast %11 : vector<152xf32> to vector<152x1xf32>
    %13 = vector.broadcast %12 : vector<152x1xf32> to vector<152x128xf32>
    %14 = arith.divf %10, %13 : vector<152x128xf32>
    %c0_7 = arith.constant 0 : index
    %c0_8 = arith.constant 0 : index
    %15 = vector.load %arg4[%c0_7, %c0_8] : memref<152x128xf32, #tpu.memory_space<vmem>>, vector<152x128xf32>
    tpu.vector_store %arg4[%c0_7, %c0_8], %14 {strides = array<i32>} : memref<152x128xf32, #tpu.memory_space<vmem>>, vector<152x128xf32>,
    return
  }
  func.func @transform_0(%arg0: i32) -> (i32, i32) {
    %c0_i32 = arith.constant 0 : i32
    %c0_i32_0 = arith.constant 0 : i32
    return %arg0, %c0_i32 : i32, i32
  }
  func.func @transform_1(%arg0: i32) -> (i32, i32) {
    %c0_i32 = arith.constant 0 : i32
    %c0_i32_0 = arith.constant 0 : i32
    %c0_i32_1 = arith.constant 0 : i32
    return %c0_i32, %c0_i32_0 : i32, i32
  }
  func.func @transform_2(%arg0: i32) -> (i32, i32) {
    %c0_i32 = arith.constant 0 : i32
    %c0_i32_0 = arith.constant 0 : i32
    %c0_i32_1 = arith.constant 0 : i32
    return %c0_i32, %c0_i32_0 : i32, i32
  }
  func.func @transform_3(%arg0: i32) -> (i32, i32) {
    %c0_i32 = arith.constant 0 : i32
    %c0_i32_0 = arith.constant 0 : i32
    return %arg0, %c0_i32 : i32, i32
  }
}

</mosaic_0001>

<bundles_post_ra>
// kernel: tpu_custom_call.1
= control target key start
LH: loop header
LB: loop body
LE: loop exit
PB: predicated region body
PF: predicated region fallthrough
CT: control target
= control target key end

     0   :  { %8 = vsyncpa [#allocation3], 0  ;;  %s1418_s0 = inlined_call_operand.vmem [shape: f32[300,32], index: 0, kind: input, shape index: {}]   ;;  %s1419_s1 = inlined_call_operand.vmem [shape: f32[32,128], index: 1, kind: input, shape index: {}]   ;;  %s1420_s2 = inlined_call_operand.vmem [shape: f32[1,128], index: 2, kind: input, shape index: {}]   ;;  %s1421_s3 = inlined_call_operand.hbm [shape: f32[300,128], index: 3, kind: output, shape index: {}]  }
   0x1   :  { %10 = vsyncpa [#allocation3 + $0x1], 0  ;;  %s1024_s12 = smov 0   ;;  %s1026_s13 = smov 0  }
   0x2   :  { %s1028_s14 = smov 0   ;;  %s1030_s15 = smov 0  }
   0x3 LB: > { %s1045_s16 = sadd.s32 4294967295, %s996_s15   ;;  %s686_s17 = sadd.s32 4294967294, %s996_s15   ;;  %s996_s15 = sphi %s1030_s15, %s1427_s15   ;;  %s992_s14 = sphi %s1028_s14, %s1426_s14   ;;  %s988_s13 = sphi %s1026_s13, %s1425_s13   ;;  %s984_s12 = sphi %s1024_s12, %s1424_s12  }
   0x4   : > { %s1049_s18 = sadd.s32 1, %s996_s15   ;;  %s91_s19 = sadd.s32 1, %s992_s14 }
   0x5   : > { %s88_s20 = ssub.s32 %s996_s15, %s1049_s18  ;;  %p101_p0 = scmp.ne.s32.totalorder %s992_s14, %s988_s13 }
   0x6   : > { %p89_p1 = scmp.eq.s32.totalorder %s88_s20, 0  ;;  %p102_p2 = scmp.eq.s32.totalorder %s1045_s16, 1 }
   0x7   : > { %p107_p3 = scmp.ne.s32.totalorder %s988_s13, %s984_s12  ;;  %p108_p4 = scmp.eq.s32.totalorder %s686_s17, 1 }
   0x8   : > { %s1060_s21 = scalar_select %p89_p1, %s992_s14, %s91_s19  }
   0x9   : > { %p1062_p5 = por %p102_p2, %p101_p0  ;;  %p1066_p6 = por %p108_p4, %p107_p3 }
   0xa   : > { %p689_p7 = scmp.ge.s32.totalorder %s996_s15, 1  ;;  %p141_p8 = scmp.lt.s32.totalorder %s996_s15, 3 }
   0xc   : > { %p142_p9 = pnand %p689_p7, %p141_p8 }
   0xd   : > { %v191_v0 = vld [vmem:[%s1419_s1] sm:$0xff] (!%p142_p9)  ;;  %v192_v1 = vld [vmem:[%s1419_s1 + $0x8] sm:$0xff] (!%p142_p9)  ;;  %v193_v2 = vld [vmem:[%s1419_s1 + $0x10] sm:$0xff] (!%p142_p9)  ;;  %v998_v3 = vmov (!%p142_p9), 0.0|0.0   ;;  %s165_s5 = smul.u32 (!%p142_p9), 19, %s1045_s16  ;;  %vm999_vm0 = vmmov (!%p142_p9), 0  }
   0xe   : > { %145 = sbr.rel (%p142_p9) target bundleno = 608 (0x260), region = 32  ;;  %803 = vmatprep.subr.bf16.mxu0 (!%p142_p9), %v998_v3  ;;  %809 = vmatprep.subr.bf16.mxu1 (!%p142_p9), %v998_v3  ;;  %v804_v4 = vpack.c.bf16 (!%p142_p9), %v192_v1, %v191_v0  ;;  %v194_v5 = vld [vmem:[%s1419_s1 + $0x18] sm:$0xff] (!%p142_p9)  ;;  %v1000_v6 = vmov (!%p142_p9), 0.0   ;;  %vm202_vm1 = vcmask (!%p142_p9), 261120   ;;  %v1169_v27 = vld [vmem:[%s1420_s2] ss:$0 sm:$0xff] (!%p142_p9) }
   0xf   : > { %746 = vmatprep.mubr.msk.f32.mxu0 (!%p142_p9), %vm999_vm0, %v1000_v6  ;;  %776 = vmatprep.mubr.msk.f32.mxu1 (!%p142_p9), %vm999_vm0, %v1000_v6  ;;  %v807_v7 = vpack.c.bf16 (!%p142_p9), %v194_v5, %v193_v2  ;;  %p166_p10 = scmp.lt.s32.totalorder (!%p142_p9), %s165_s5, 37  ;;  %s162_s17 = sand.u32 (!%p142_p9), 1, %s988_s13  }
  0x10   : > { %805 = vmatpush3.bf16.msra.mxu0 (!%p142_p9), %v804_v4  ;;  %811 = vmatpush3.bf16.msra.mxu1 (!%p142_p9), %v804_v4  ;;  %s813_s19 = smul.u32 (!%p142_p9), 152, %s162_s17  ;;  %s1001_s30 = smov (!%p142_p9), [#allocation2]  }
  0x11   : > { %806 = vmatprep.subr.bf16.mxu0 (!%p142_p9), %v998_v3  ;;  %810 = vmatprep.subr.bf16.mxu1 (!%p142_p9), %v998_v3  ;;  %s714_s24 = smul.u32 (!%p142_p9), 2432, %s1045_s16  ;;  %s1377_s16 = scalar_lea.sflag (!%p142_p9), [#allocation3], %s162_s17 }
  0x12   : > { %s1327_s20 = scalar_lea.vmem (!%p142_p9), [#allocation2], %s813_s19  ;;  %s938_s4 = sshll.u32 (!%p142_p9), %s1001_s30, 4  ;;  %s939_s4 = int_to_ptr.vmem [resolvable:$false] %s938_s4 }
  0x13   : > { %s624_s25 = sshll.u32 (!%p142_p9), %s1327_s20, 4  ;;  %s1369_s28 = scalar_lea.hbm (!%p142_p9), %s1421_s3, %s714_s24  ;;  %s1372_s25 = int_to_ptr.vmem [resolvable:$true] %s624_s25 }
  0x14   : > { %808 = vmatpush3.bf16.msra.mxu0 (!%p142_p9), %v807_v7  ;;  %812 = vmatpush3.bf16.msra.mxu1 (!%p142_p9), %v807_v7  ;;  %s934_s29 = scalar_lea.vmem (!%p142_p9), %s1372_s25, 2432  ;;  %p941_p0 = scmp.lt.s32.totalorder (!%p142_p9), %s1372_s25, %s939_s4 }
  0x15   : > { %s1429_s5 = smov (!%p166_p10, %s165_s5), 37  ;;  %p935_p11 = scmp.ne.s32.totalorder %s1372_s25, %s934_s29 }
  0x16   : > { %s690_s6 = sshll.u32 %s1429_s5, 3  ;;  %s940_s5 = scalar_lea.vmem %s939_s4, 4864 }
  0x17   : > { %s1092_s9 = scalar_lea.vmem %s1418_s0, %s690_s6  ;;  %p936_p12 = pnand %p935_p11, %p1062_p5 }
  0x18   : > { %v172_v8 = vld [vmem:[%s1092_s9] sm:$0xff]  ;;  %v182_v9 = vld [vmem:[%s1092_s9 + $0x50] sm:$0xff]  ;;  %v173_v10 = vld [vmem:[%s1092_s9 + $0x8] sm:$0xff]  ;;  %p942_p1 = scmp.lt.s32.totalorder %s940_s5, %s934_s29 }
  0x19   : > { %747 = vmatmul.mubr.msk.f32.vlgmr.msra.gmra.mrb[0].mxu0 %vm202_vm1, %v172_v8  ;;  %777 = vmatmul.mubr.msk.f32.vlgmr.msra.gmra.mrb[0].mxu1 %vm202_vm1, %v182_v9  ;;  %v183_v11 = vld [vmem:[%s1092_s9 + $0x58] sm:$0xff]  ;;  %v174_v12 = vld [vmem:[%s1092_s9 + $0x10] sm:$0xff]  ;;  %v184_v13 = vld [vmem:[%s1092_s9 + $0x60] sm:$0xff]  ;;  %p937_p13 = pneg %p936_p12 }
  0x1a   : > { %749 = vmatprep.mubr.msk.f32.mxu0 %vm999_vm0, %v1000_v6  ;;  %779 = vmatprep.mubr.msk.f32.mxu1 %vm999_vm0, %v1000_v6  ;;  %v175_v14 = vld [vmem:[%s1092_s9 + $0x18] sm:$0xff]  ;;  %v185_v15 = vld [vmem:[%s1092_s9 + $0x68] sm:$0xff]  ;;  %v176_v16 = vld [vmem:[%s1092_s9 + $0x20] sm:$0xff]  ;;  %p943_p2 = por %p942_p1, %p941_p0 }
  0x1b   : > { %v186_v17 = vld [vmem:[%s1092_s9 + $0x70] sm:$0xff]  ;;  %v177_v18 = vld [vmem:[%s1092_s9 + $0x28] sm:$0xff]  ;;  %v187_v19 = vld [vmem:[%s1092_s9 + $0x78] sm:$0xff] }
  0x1c   : > { %v178_v20 = vld [vmem:[%s1092_s9 + $0x30] sm:$0xff]  ;;  %v188_v21 = vld [vmem:[%s1092_s9 + $0x80] sm:$0xff]  ;;  %v179_v22 = vld [vmem:[%s1092_s9 + $0x38] sm:$0xff]  ;;  %p944_p3 = pnand %p943_p2, %p937_p13 }
  0x1d   : > { %750 = vmatmul.mubr.msk.f32.gmra.mrb[2].mxu0 %vm202_vm1, %v173_v10  ;;  %780 = vmatmul.mubr.msk.f32.gmra.mrb[2].mxu1 %vm202_vm1, %v183_v11  ;;  %v189_v23 = vld [vmem:[%s1092_s9 + $0x88] sm:$0xff]  ;;  %v180_v24 = vld [vmem:[%s1092_s9 + $0x40] sm:$0xff]  ;;  %v190_v25 = vld [vmem:[%s1092_s9 + $0x90] sm:$0xff] }
  0x1e   : > { %752 = vmatprep.mubr.msk.f32.mxu0 %vm999_vm0, %v1000_v6  ;;  %782 = vmatprep.mubr.msk.f32.mxu1 %vm999_vm0, %v1000_v6  ;;  %v181_v26 = vld [vmem:[%s1092_s9 + $0x48] sm:$0xff] }
  0x21   : > { %753 = vmatmul.mubr.msk.f32.gmra.mrb[4].mxu0 %vm202_vm1, %v174_v12  ;;  %783 = vmatmul.mubr.msk.f32.gmra.mrb[4].mxu1 %vm202_vm1, %v184_v13 }
  0x22   : > { %755 = vmatprep.mubr.msk.f32.mxu0 %vm999_vm0, %v1000_v6  ;;  %785 = vmatprep.mubr.msk.f32.mxu1 %vm999_vm0, %v1000_v6 }
  0x25   : > { %756 = vmatmul.mubr.msk.f32.gmra.mrb[6].mxu0 %vm202_vm1, %v175_v14  ;;  %786 = vmatmul.mubr.msk.f32.gmra.mrb[6].mxu1 %vm202_vm1, %v185_v15 }
  0x26   : > { %758 = vmatprep.mubr.msk.f32.mxu0 %vm999_vm0, %v1000_v6  ;;  %788 = vmatprep.mubr.msk.f32.mxu1 %vm999_vm0, %v1000_v6 }
  0x29   : > { %759 = vmatmul.mubr.msk.f32.gmra.mrb[8].mxu0 %vm202_vm1, %v176_v16  ;;  %789 = vmatmul.mubr.msk.f32.gmra.mrb[8].mxu1 %vm202_vm1, %v186_v17 }
  0x2a   : > { %761 = vmatprep.mubr.msk.f32.mxu0 %vm999_vm0, %v1000_v6  ;;  %791 = vmatprep.mubr.msk.f32.mxu1 %vm999_vm0, %v1000_v6 }
  0x2d   : > { %762 = vmatmul.mubr.msk.f32.gmra.mrb[10].mxu0 %vm202_vm1, %v177_v18  ;;  %792 = vmatmul.mubr.msk.f32.gmra.mrb[10].mxu1 %vm202_vm1, %v187_v19 }
  0x2e   : > { %764 = vmatprep.mubr.msk.f32.mxu0 %vm999_vm0, %v1000_v6  ;;  %794 = vmatprep.mubr.msk.f32.mxu1 %vm999_vm0, %v1000_v6 }
  0x31   : > { %765 = vmatmul.mubr.msk.f32.gmra.mrb[12].mxu0 %vm202_vm1, %v178_v20  ;;  %795 = vmatmul.mubr.msk.f32.gmra.mrb[12].mxu1 %vm202_vm1, %v188_v21 }
  0x32   : > { %767 = vmatprep.mubr.msk.f32.mxu0 %vm999_vm0, %v1000_v6  ;;  %797 = vmatprep.mubr.msk.f32.mxu1 %vm999_vm0, %v1000_v6 }
  0x35   : > { %768 = vmatmul.mubr.msk.f32.gmra.mrb[14].mxu0 %vm202_vm1, %v179_v22  ;;  %798 = vmatmul.mubr.msk.f32.gmra.mrb[14].mxu1 %vm202_vm1, %v189_v23 }
  0x36   : > { %770 = vmatprep.mubr.msk.f32.mxu0 %vm999_vm0, %v1000_v6  ;;  %800 = vmatprep.mubr.msk.f32.mxu1 %vm999_vm0, %v1000_v6 }
  0x39   : > { %771 = vmatmul.mubr.msk.f32.gmra.mrb[16].mxu0 %vm202_vm1, %v180_v24  ;;  %801 = vmatmul.mubr.msk.f32.gmra.mrb[16].mxu1 %vm202_vm1, %v190_v25 }
  0x3a   : > { %773 = vmatprep.mubr.msk.f32.mxu0 %vm999_vm0, %v1000_v6 }
  0x3d   : > { %774 = vmatmul.mubr.msk.f32.gmra.mrb[18].mxu0 %vm202_vm1, %v181_v26 }
  0xec   : > { %v326_v28 = vpop.f32.mrb[0].mxu0  ;;  %v376_v29 = vpop.f32.mrb[0].mxu1 }
  0xed   : > { %v1172_v30 = vadd.f32 %v1169_v27, %v326_v28  ;;  %v748_v31 = vpop.f32.mrb[1].mxu0  ;;  %v778_v32 = vpop.f32.mrb[1].mxu1  ;;  %v1175_v33 = vadd.f32 %v1169_v27, %v376_v29 }
  0xef   : > { %420 = vmax.xlane.f32.xlu0 %v1172_v30 }
  0xf0   : > { %v331_v34 = vpop.f32.mrb[2].mxu0  ;;  %v381_v35 = vpop.f32.mrb[2].mxu1 }
  0xf1   : > { %v1179_v36 = vadd.f32 %v1169_v27, %v381_v35  ;;  %v751_v37 = vpop.f32.mrb[3].mxu0  ;;  %v781_v38 = vpop.f32.mrb[3].mxu1  ;;  %v1184_v41 = vadd.f32 %v1169_v27, %v331_v34 }
  0xf3   : > { %442 = vmax.xlane.f32.xlu1 %v1179_v36  ;;  %440 = vmax.xlane.f32.xlu0 %v1175_v33 }
  0xf4   : > { %v336_v39 = vpop.f32.mrb[4].mxu0  ;;  %v386_v40 = vpop.f32.mrb[4].mxu1 }
  0xf5   : > { %v1187_v42 = vadd.f32 %v1169_v27, %v336_v39  ;;  %v754_v43 = vpop.f32.mrb[5].mxu0  ;;  %v784_v44 = vpop.f32.mrb[5].mxu1  ;;  %v1192_v45 = vadd.f32 %v1169_v27, %v386_v40 }
  0xf7   : > { %422 = vmax.xlane.f32.xlu0 %v1184_v41  ;;  %424 = vmax.xlane.f32.xlu1 %v1187_v42 }
  0xf8   : > { %v341_v46 = vpop.f32.mrb[6].mxu0  ;;  %v391_v47 = vpop.f32.mrb[6].mxu1 }
  0xf9   : > { %v1195_v48 = vadd.f32 %v1169_v27, %v341_v46  ;;  %v757_v49 = vpop.f32.mrb[7].mxu0  ;;  %v787_v50 = vpop.f32.mrb[7].mxu1  ;;  %v1200_v51 = vadd.f32 %v1169_v27, %v391_v47 }
  0xfb   : > { %444 = vmax.xlane.f32.xlu0 %v1192_v45  ;;  %426 = vmax.xlane.f32.xlu1 %v1195_v48 }
  0xfc   : > { %v346_v52 = vpop.f32.mrb[8].mxu0  ;;  %v396_v53 = vpop.f32.mrb[8].mxu1 }
  0xfd   : > { %v1203_v54 = vadd.f32 %v1169_v27, %v346_v52  ;;  %v760_v55 = vpop.f32.mrb[9].mxu0  ;;  %v790_v56 = vpop.f32.mrb[9].mxu1  ;;  %v1208_v57 = vadd.f32 %v1169_v27, %v396_v53 }
  0xff   : > { %446 = vmax.xlane.f32.xlu1 %v1200_v51  ;;  %428 = vmax.xlane.f32.xlu0 %v1203_v54 }
 0x100   : > { %v351_v58 = vpop.f32.mrb[10].mxu0  ;;  %v401_v59 = vpop.f32.mrb[10].mxu1 }
 0x101   : > { %v1211_v60 = vadd.f32 %v1169_v27, %v351_v58  ;;  %v763_v61 = vpop.f32.mrb[11].mxu0  ;;  %v793_v62 = vpop.f32.mrb[11].mxu1  ;;  %v1216_v63 = vadd.f32 %v1169_v27, %v401_v59 }
 0x103   : > { %448 = vmax.xlane.f32.xlu0 %v1208_v57  ;;  %430 = vmax.xlane.f32.xlu1 %v1211_v60 }
 0x104   : > { %v356_v0 = vpop.f32.mrb[12].mxu0  ;;  %v406_v1 = vpop.f32.mrb[12].mxu1 }
 0x105   : > { %v1219_v2 = vadd.f32 %v1169_v27, %v356_v0  ;;  %v766_v3 = vpop.f32.mrb[13].mxu0  ;;  %v796_v4 = vpop.f32.mrb[13].mxu1  ;;  %v1224_v5 = vadd.f32 %v1169_v27, %v406_v1 }
 0x107   : > { %450 = vmax.xlane.f32.xlu1 %v1216_v63  ;;  %432 = vmax.xlane.f32.xlu0 %v1219_v2 }
 0x108   : > { %v361_v6 = vpop.f32.mrb[14].mxu0  ;;  %v411_v7 = vpop.f32.mrb[14].mxu1 }
 0x109   : > { %v1227_v8 = vadd.f32 %v1169_v27, %v361_v6  ;;  %v769_v9 = vpop.f32.mrb[15].mxu0  ;;  %v799_v10 = vpop.f32.mrb[15].mxu1  ;;  %v1244_v20 = vadd.f32 %v1169_v27, %v411_v7 }
 0x10b   : > { %452 = vmax.xlane.f32.xlu0 %v1224_v5  ;;  %434 = vmax.xlane.f32.xlu1 %v1227_v8 }
 0x10c   : > { %v366_v11 = vpop.f32.mrb[16].mxu0  ;;  %v416_v12 = vpop.f32.mrb[16].mxu1 }
 0x10d   : > { %v1232_v13 = vadd.f32 %v1169_v27, %v366_v11  ;;  %v772_v14 = vpop.f32.mrb[17].mxu0  ;;  %v802_v15 = vpop.f32.mrb[17].mxu1  ;;  %v1236_v16 = vadd.f32 %v1169_v27, %v416_v12 }
 0x10f   : > { %436 = vmax.xlane.f32.xlu0 %v1232_v13 }
 0x110   : > { %v371_v17 = vpop.f32.mrb[18].mxu0 }
 0x111   : > { %v1239_v18 = vadd.f32 %v1169_v27, %v371_v17  ;;  %v775_v19 = vpop.f32.mrb[19].mxu0 }
 0x113   : > { %456 = vmax.xlane.f32.xlu0 %v1236_v16  ;;  %438 = vmax.xlane.f32.xlu1 %v1239_v18 }
 0x117   : > { %454 = vmax.xlane.f32.xlu1 %v1244_v20 }
 0x17c   : > { %v421_v21 = vpop.xlane.xlu0 %420 }
 0x17d   : > { %v458_v22 = vsub.f32 %v1172_v30, %v421_v21 }
 0x17f   : > { %v477_v23 = vmul.f32 1.442695, %v458_v22 }
 0x180   : > { %v443_v24 = vpop.xlane.xlu1 %442  ;;  %v441_v25 = vpop.xlane.xlu0 %440 }
 0x181   : > { %858 = vpow2.f32 %v477_v23  ;;  %v468_v26 = vsub.f32 %v1175_v33, %v441_v25  ;;  %v469_v29 = vsub.f32 %v1179_v36, %v443_v24 }
 0x183   : > { %v497_v28 = vmul.f32 1.442695, %v468_v26  ;;  %v499_v38 = vmul.f32 1.442695, %v469_v29 }
 0x184   : > { %v423_v31 = vpop.xlane.xlu0 %422  ;;  %v425_v32 = vpop.xlane.xlu1 %424 }
 0x185   : > { %v459_v34 = vsub.f32 %v1184_v41, %v423_v31  ;;  %v460_v27 = vsub.f32 %v1187_v42, %v425_v32  ;;  %860 = vpow2.f32 %v497_v28 }
 0x187   : > { %v479_v35 = vmul.f32 1.442695, %v459_v34  ;;  %v481_v37 = vmul.f32 1.442695, %v460_v27 }
 0x188   : > { %v445_v30 = vpop.xlane.xlu0 %444  ;;  %v427_v39 = vpop.xlane.xlu1 %426 }
 0x189   : > { %862 = vpow2.f32 %v479_v35  ;;  %v470_v40 = vsub.f32 %v1192_v45, %v445_v30  ;;  %v461_v33 = vsub.f32 %v1195_v48, %v427_v39 }
 0x18a   : > { %864 = vpow2.f32 %v481_v37 }
 0x18b   : > { %v1254_v43 = vpop.eup %858  ;;  %v501_v36 = vmul.f32 1.442695, %v470_v40  ;;  %866 = vpow2.f32 %v499_v38  ;;  %v483_v42 = vmul.f32 1.442695, %v461_v33 }
 0x18c   : > { %v447_v44 = vpop.xlane.xlu1 %446  ;;  %v429_v41 = vpop.xlane.xlu0 %428  ;;  %515 = vadd.xlane.f32.xlu1 %v1254_v43 }
 0x18d   : > { %868 = vpow2.f32 %v501_v36  ;;  %v471_v46 = vsub.f32 %v1200_v51, %v447_v44  ;;  %v462_v47 = vsub.f32 %v1203_v54, %v429_v41 }
 0x18e   : > { %870 = vpow2.f32 %v483_v42 }
 0x18f   : > { %v485_v49 = vmul.f32 1.442695, %v462_v47  ;;  %v1259_v50 = vpop.eup %860  ;;  %v503_v45 = vmul.f32 1.442695, %v471_v46 }
 0x190   : > { %v449_v48 = vpop.xlane.xlu0 %448  ;;  %v431_v52 = vpop.xlane.xlu1 %430  ;;  %535 = vadd.xlane.f32.xlu1 %v1259_v50 }
 0x191   : > { %v472_v53 = vsub.f32 %v1208_v57, %v449_v48  ;;  %v463_v55 = vsub.f32 %v1211_v60, %v431_v52  ;;  %872 = vpow2.f32 %v485_v49 }
 0x192   : > { %874 = vpow2.f32 %v503_v45 }
 0x193   : > { %v1264_v56 = vpop.eup %862  ;;  %v505_v58 = vmul.f32 1.442695, %v472_v53  ;;  %v487_v61 = vmul.f32 1.442695, %v463_v55 }
 0x194   : > { %v1266_v51 = vpop.eup %864  ;;  %v451_v54 = vpop.xlane.xlu1 %450  ;;  %517 = vadd.xlane.f32.xlu0 %v1264_v56 }
 0x195   : > { %v433_v59 = vpop.xlane.xlu0 %432  ;;  %876 = vpow2.f32 %v505_v58  ;;  %v473_v62 = vsub.f32 %v1216_v63, %v451_v54  ;;  %519 = vadd.xlane.f32.xlu1 %v1266_v51  ;;  %v1272_v60 = vpop.eup %866 }
 0x196   : > { %v464_v57 = vsub.f32 %v1219_v2, %v433_v59  ;;  %878 = vpow2.f32 %v487_v61 }
 0x197   : > { %v1274_v0 = vpop.eup %868  ;;  %v507_v3 = vmul.f32 1.442695, %v473_v62 }
 0x198   : > { %v489_v1 = vmul.f32 1.442695, %v464_v57  ;;  %v435_v6 = vpop.xlane.xlu1 %434  ;;  %537 = vadd.xlane.f32.xlu0 %v1272_v60  ;;  %v1280_v63 = vpop.eup %870 }
 0x199   : > { %v453_v4 = vpop.xlane.xlu0 %452  ;;  %v465_v9 = vsub.f32 %v1227_v8, %v435_v6  ;;  %539 = vadd.xlane.f32.xlu1 %v1274_v0 }
 0x19a   : > { %v474_v7 = vsub.f32 %v1224_v5, %v453_v4  ;;  %880 = vpow2.f32 %v489_v1 }
 0x19b   : > { %v1282_v10 = vpop.eup %872  ;;  %882 = vpow2.f32 %v507_v3  ;;  %v491_v11 = vmul.f32 1.442695, %v465_v9 }
 0x19c   : > { %v509_v2 = vmul.f32 1.442695, %v474_v7  ;;  %521 = vadd.xlane.f32.xlu0 %v1280_v63  ;;  %v1287_v5 = vpop.eup %874 }
 0x19d   : > { %v437_v12 = vpop.xlane.xlu0 %436  ;;  %523 = vadd.xlane.f32.xlu1 %v1282_v10 }
 0x19e   : > { %884 = vpow2.f32 %v509_v2  ;;  %v466_v14 = vsub.f32 %v1232_v13, %v437_v12 }
 0x19f   : > { %v1289_v8 = vpop.eup %876  ;;  %886 = vpow2.f32 %v491_v11 }
 0x1a0   : > { %v493_v15 = vmul.f32 1.442695, %v466_v14  ;;  %541 = vadd.xlane.f32.xlu0 %v1287_v5  ;;  %v439_v19 = vpop.xlane.xlu1 %438  ;;  %v1295_v13 = vpop.eup %878 }
 0x1a1   : > { %v457_v17 = vpop.xlane.xlu0 %456  ;;  %543 = vadd.xlane.f32.xlu1 %v1289_v8  ;;  %v467_v22 = vsub.f32 %v1239_v18, %v439_v19 }
 0x1a2   : > { %888 = vpow2.f32 %v493_v15  ;;  %v476_v21 = vsub.f32 %v1236_v16, %v457_v17 }
 0x1a3   : > { %v495_v24 = vmul.f32 1.442695, %v467_v22 }
 0x1a4   : > { %v513_v23 = vmul.f32 1.442695, %v476_v21  ;;  %v1297_v25 = vpop.eup %880  ;;  %525 = vadd.xlane.f32.xlu0 %v1295_v13  ;;  %v455_v26 = vpop.xlane.xlu1 %454 }
 0x1a5   : > { %527 = vadd.xlane.f32.xlu1 %v1297_v25  ;;  %v475_v28 = vsub.f32 %v1244_v20, %v455_v26  ;;  %v1302_v29 = vpop.eup %882 }
 0x1a6   : > { %890 = vpow2.f32 %v513_v23 }
 0x1a7   : > { %892 = vpow2.f32 %v495_v24  ;;  %v511_v18 = vmul.f32 1.442695, %v475_v28 }
 0x1a8   : > { %v1304_v16 = vpop.eup %884  ;;  %545 = vadd.xlane.f32.xlu0 %v1302_v29 }
 0x1a9   : > { %894 = vpow2.f32 %v511_v18  ;;  %547 = vadd.xlane.f32.xlu1 %v1304_v16  ;;  %v1308_v31 = vpop.eup %886 }
 0x1ac   : > { %v1310_v32 = vpop.eup %888  ;;  %529 = vadd.xlane.f32.xlu0 %v1308_v31 }
 0x1ad   : > { %531 = vadd.xlane.f32.xlu1 %v1310_v32 }
 0x1b0   : > { %v1314_v20 = vpop.eup %890 }
 0x1b1   : > { %v1316_v34 = vpop.eup %892  ;;  %551 = vadd.xlane.f32.xlu1 %v1314_v20 }
 0x1b2   : > { %533 = vadd.xlane.f32.xlu0 %v1316_v34 }
 0x1b3   : > { %v1320_v27 = vpop.eup %894 }
 0x1b6   : > { %549 = vadd.xlane.f32.xlu0 %v1320_v27 }
 0x219   : > { %v516_v35 = vpop.xlane.xlu1 %515 }
 0x21a   : > { %896 = vrcp.f32 %v516_v35 }
 0x21d   : > { %v536_v37 = vpop.xlane.xlu1 %535 }
 0x21e   : > { %898 = vrcp.f32 %v536_v37 }
 0x221   : > { %v518_v38 = vpop.xlane.xlu0 %517 }
 0x222   : > { %900 = vrcp.f32 %v518_v38  ;;  %v520_v30 = vpop.xlane.xlu1 %519 }
 0x223   : > { %902 = vrcp.f32 %v520_v30 }
 0x224   : > { %v897_v39 = vpop.eup %896 }
 0x225   : > { %v554_v40 = vmul.f32 %v897_v39, %v1254_v43  ;;  %v538_v33 = vpop.xlane.xlu0 %537 }
 0x226   : > { %904 = vrcp.f32 %v538_v33  ;;  %v540_v36 = vpop.xlane.xlu1 %539 }
 0x227   : > { %591 = vst [vmem:[%s1327_s20] sm:$0xff] %v554_v40  ;;  %906 = vrcp.f32 %v540_v36 }
 0x228   : > { %v899_v44 = vpop.eup %898 }
 0x229   : > { %v522_v41 = vpop.xlane.xlu0 %521  ;;  %v574_v42 = vmul.f32 %v899_v44, %v1259_v50 }
 0x22a   : > { %908 = vrcp.f32 %v522_v41  ;;  %v524_v46 = vpop.xlane.xlu1 %523 }
 0x22b   : > { %910 = vrcp.f32 %v524_v46  ;;  %601 = vst [vmem:[%s1327_s20 + $0x50] sm:$0xff] %v574_v42 }
 0x22c   : > { %v901_v47 = vpop.eup %900 }
 0x22d   : > { %v903_v43 = vpop.eup %902  ;;  %v556_v49 = vmul.f32 %v901_v47, %v1264_v56  ;;  %v542_v45 = vpop.xlane.xlu0 %541 }
 0x22e   : > { %v558_v48 = vmul.f32 %v903_v43, %v1266_v51  ;;  %912 = vrcp.f32 %v542_v45  ;;  %v544_v52 = vpop.xlane.xlu1 %543 }
 0x22f   : > { %592 = vst [vmem:[%s1327_s20 + $0x8] sm:$0xff] %v556_v49  ;;  %914 = vrcp.f32 %v544_v52 }
 0x230   : > { %v905_v53 = vpop.eup %904  ;;  %593 = vst [vmem:[%s1327_s20 + $0x10] sm:$0xff] %v558_v48 }
 0x231   : > { %v907_v50 = vpop.eup %906  ;;  %v576_v55 = vmul.f32 %v905_v53, %v1272_v60  ;;  %v526_v58 = vpop.xlane.xlu0 %525 }
 0x232   : > { %v578_v54 = vmul.f32 %v907_v50, %v1274_v0  ;;  %916 = vrcp.f32 %v526_v58  ;;  %v528_v56 = vpop.xlane.xlu1 %527 }
 0x233   : > { %602 = vst [vmem:[%s1327_s20 + $0x58] sm:$0xff] %v576_v55  ;;  %918 = vrcp.f32 %v528_v56 }
 0x234   : > { %v909_v51 = vpop.eup %908  ;;  %603 = vst [vmem:[%s1327_s20 + $0x60] sm:$0xff] %v578_v54 }
 0x235   : > { %v911_v59 = vpop.eup %910  ;;  %v560_v61 = vmul.f32 %v909_v51, %v1280_v63  ;;  %v546_v62 = vpop.xlane.xlu0 %545 }
 0x236   : > { %v562_v57 = vmul.f32 %v911_v59, %v1282_v10  ;;  %920 = vrcp.f32 %v546_v62  ;;  %v548_v60 = vpop.xlane.xlu1 %547 }
 0x237   : > { %594 = vst [vmem:[%s1327_s20 + $0x18] sm:$0xff] %v560_v61  ;;  %922 = vrcp.f32 %v548_v60 }
 0x238   : > { %v913_v0 = vpop.eup %912  ;;  %595 = vst [vmem:[%s1327_s20 + $0x20] sm:$0xff] %v562_v57 }
 0x239   : > { %v915_v1 = vpop.eup %914  ;;  %v580_v3 = vmul.f32 %v913_v0, %v1287_v5  ;;  %v530_v4 = vpop.xlane.xlu0 %529 }
 0x23a   : > { %v582_v6 = vmul.f32 %v915_v1, %v1289_v8  ;;  %924 = vrcp.f32 %v530_v4  ;;  %v532_v7 = vpop.xlane.xlu1 %531 }
 0x23b   : > { %604 = vst [vmem:[%s1327_s20 + $0x68] sm:$0xff] %v580_v3  ;;  %926 = vrcp.f32 %v532_v7 }
 0x23c   : > { %v917_v9 = vpop.eup %916  ;;  %605 = vst [vmem:[%s1327_s20 + $0x70] sm:$0xff] %v582_v6 }
 0x23d   : > { %v919_v63 = vpop.eup %918  ;;  %v564_v2 = vmul.f32 %v917_v9, %v1295_v13 }
 0x23e   : > { %v566_v10 = vmul.f32 %v919_v63, %v1297_v25  ;;  %v552_v12 = vpop.xlane.xlu1 %551 }
 0x23f   : > { %v534_v11 = vpop.xlane.xlu0 %533  ;;  %596 = vst [vmem:[%s1327_s20 + $0x28] sm:$0xff] %v564_v2 }
 0x240   : > { %928 = vrcp.f32 %v534_v11  ;;  %v921_v14 = vpop.eup %920  ;;  %597 = vst [vmem:[%s1327_s20 + $0x30] sm:$0xff] %v566_v10 }
 0x241   : > { %930 = vrcp.f32 %v552_v12  ;;  %v923_v5 = vpop.eup %922  ;;  %v584_v8 = vmul.f32 %v921_v14, %v1302_v29 }
 0x242   : > { %v586_v15 = vmul.f32 %v923_v5, %v1304_v16 }
 0x243   : > { %v550_v17 = vpop.xlane.xlu0 %549  ;;  %606 = vst [vmem:[%s1327_s20 + $0x78] sm:$0xff] %v584_v8 }
 0x244   : > { %932 = vrcp.f32 %v550_v17  ;;  %v925_v19 = vpop.eup %924  ;;  %607 = vst [vmem:[%s1327_s20 + $0x80] sm:$0xff] %v586_v15 }
 0x245   : > { %v927_v21 = vpop.eup %926  ;;  %v568_v22 = vmul.f32 %v925_v19, %v1308_v31 }
 0x246   : > { %v570_v13 = vmul.f32 %v927_v21, %v1310_v32 }
 0x247   : > { %598 = vst [vmem:[%s1327_s20 + $0x38] sm:$0xff] %v568_v22 }
 0x248   : > { %599 = vst [vmem:[%s1327_s20 + $0x40] sm:$0xff] %v570_v13 }
 0x24a   : > { %v929_v23 = vpop.eup %928 }
 0x24b   : > { %v931_v24 = vpop.eup %930  ;;  %v572_v25 = vmul.f32 %v929_v23, %v1316_v34 }
 0x24c   : > { %v590_v26 = vmul.f32 %v931_v24, %v1314_v20 }
 0x24d   : > { %600 = vst [vmem:[%s1327_s20 + $0x48] sm:$0xff] %v572_v25 }
 0x24e   : > { %v933_v28 = vpop.eup %932  ;;  %609 = vst [vmem:[%s1327_s20 + $0x90] sm:$0xff] %v590_v26 }
 0x24f   : > { %v588_v29 = vmul.f32 %v933_v28, %v1320_v27 }
 0x251   : > { %608 = vst [vmem:[%s1327_s20 + $0x88] sm:$0xff] %v588_v29 }
 0x252   : > { %947 = shalt.err (!%p944_p3)
}
 0x253   : > { %s948_s6 = scalar_lea.hbm %s1369_s28, 2432  ;;  %s952_s9 = scalar_lea.hbm %s1421_s3, 4864 }
 0x254   : > { %p949_p4 = scmp.ne.s32.totalorder %s1369_s28, %s948_s6  ;;  %p953_p9 = scmp.lt.u32.totalorder %s1369_s28, %s1421_s3 }
 0x255   : > { %p954_p10 = scmp.lt.u32.totalorder %s952_s9, %s948_s6  ;;  %p956_p12 = scmp.lt.u32.totalorder %s948_s6, %s1369_s28 }
 0x256   : > { %p950_p7 = pnand %p949_p4, %p1062_p5 }
 0x257   : > { %p955_p11 = por %p954_p10, %p953_p9 }
 0x258   : > { %p951_p8 = pneg %p950_p7 }
 0x259   : > { %p957_p13 = por %p956_p12, %p955_p11 }
 0x25b   : > { %p958_p0 = pnand %p957_p13, %p951_p8 }
 0x25d   : > { %961 = shalt.err (!%p958_p0)
}
 0x25e   : > { %s1002_s17 = smov 128   ;;  %s1003_s19 = smov 8  }
 0x25f   : > { %814 = dma.vmem_to_hbm [thread:$0]  (%p1062_p5), %s1372_s25, 2432, %s1369_s28, %s1377_s16, %s1002_s17, %s1002_s17, %s1003_s19  }
 0x260 PF: > { %p820_p1 = scmp.ge.s32.totalorder %s996_s15, 2  ;;  %s639_s20 = sand.u32 1, %s984_s12  }
 0x261   : > { %s640_s24 = scalar_lea.sflag [#allocation3], %s639_s20 }
 0x262   : > { %p817_p2 = pnand %p820_p1, %p1066_p6 }
 0x264   : > { %979 = dma.done.wait (!%p817_p2), %s640_s24, 2432  }
 0x265   : > { %981 = vsyncadd (!%p817_p2), %s640_s24, 4294964864  ;;  %p13_p3 = scmp.ge.s32.totalorder %s1049_s18, 4   ;;  %s1424_s12 = smov %s988_s13 }
 0x266   : > { %s1425_s13 = smov %s992_s14  ;;  %s1426_s14 = smov %s1060_s21 }
 0x267   : > { %s1427_s15 = smov %s1049_s18  ;;  %15 = sbr.rel (!%p13_p3) target bundleno = 3 (0x3), region = 67 }
 0x26e   :  { %645 = vsyncpa [#allocation3], 1 }
 0x26f   :  { %647 = vsyncpa [#allocation3 + $0x1], 1 }

</bundles_post_ra>
